<compile_context>
chip_gen: v7x
topology: tpu7x:2x2x1
jax: 0.10.0
libtpu: 0.0.40
codegen_flags: <defaults>
</compile_context>

<pallas_src>
import functools

import jax
import jax.numpy as jnp
from jax.experimental import pallas as pl
from jax.experimental.pallas import tpu as pltpu

HIDDEN = 128   # hidden width of the MLP (matches the PyTorch module)
LANE = 128     # TPU lane width (last dim)
SUBLANE = 8    # f32 sublane height (second-to-last dim)


def _round_up(n, m):
    return ((n + m - 1) // m) * m


def qnet_kernel(x_ref, w1_ref, b1_ref, w2_ref, b2_ref, w3_ref, b3_ref, out_ref):
    """Whole 3-layer MLP fused: 3 MXU matmuls (f32 accumulate) + VPU bias/ReLU."""
    wdt = w1_ref.dtype  # f32 (exact) or bf16 (MXU bf16 path on v6e/v7x)
    x = x_ref[...]
    h1 = jnp.dot(x.astype(wdt), w1_ref[...], preferred_element_type=jnp.float32)
    h1 = jnp.maximum(h1 + b1_ref[...], 0.0)
    h2 = jnp.dot(h1.astype(wdt), w2_ref[...], preferred_element_type=jnp.float32)
    h2 = jnp.maximum(h2 + b2_ref[...], 0.0)
    out = jnp.dot(h2.astype(wdt), w3_ref[...], preferred_element_type=jnp.float32)
    # Lane-dense (multiple-of-128) store: unmasked vst.
    out_ref[...] = (out + b3_ref[...]).astype(out_ref.dtype)


@functools.partial(jax.jit, static_argnames=("act_dim", "n_atoms", "block_b"))
def qnetwork_forward(x, params, *, act_dim, n_atoms, block_b=512):
    """x: (B, obs_dim) float32 -> logits (B, act_dim, n_atoms) float32.

    Weights are stored as (in_features, out_features) (= PyTorch W.T), biases as
    (1, out_features). Weights may be float32 or bfloat16.
    """
    w1, b1, w2, b2, w3, b3 = params
    B, obs_dim = x.shape
    out_dim = act_dim * n_atoms

    # Padded, lane-/sublane-friendly sizes.
    obs_p = _round_up(max(obs_dim, 1), LANE)            # K of first matmul -> 128
    out_p = _round_up(out_dim, LANE)                    # lane-dense output
    tb = _round_up(min(block_b, max(B, SUBLANE)), SUBLANE)  # batch tile (>= 8 rows)
    b_p = _round_up(max(B, SUBLANE), tb)
    n_blk = b_p // tb

    # Zero-pad once in the wrapper (cheap XLA glue; weights are ~100 KB total).
    f32 = jnp.float32
    x_p = jnp.zeros((b_p, obs_p), f32).at[:B, :obs_dim].set(x.astype(f32))
    w1_p = jnp.zeros((obs_p, HIDDEN), w1.dtype).at[:obs_dim, :].set(w1)
    w3_p = jnp.zeros((HIDDEN, out_p), w3.dtype).at[:, :out_dim].set(w3)
    b1_f = b1.astype(f32)
    b2_f = b2.astype(f32)
    b3_p = jnp.zeros((1, out_p), f32).at[:, :out_dim].set(b3.astype(f32))

    batch_spec = pl.BlockSpec((tb, obs_p), lambda i: (i, 0))
    out_spec = pl.BlockSpec((tb, out_p), lambda i: (i, 0))
    # Constant index map -> weights/biases stay VMEM-resident, DMA'd once.
    resident = lambda shape: pl.BlockSpec(shape, lambda i: (0, 0))

    logits_p = pl.pallas_call(
        qnet_kernel,
        out_shape=jax.ShapeDtypeStruct((b_p, out_p), jnp.float32),
        grid=(n_blk,),
        in_specs=[
            batch_spec,
            resident((obs_p, HIDDEN)), resident((1, HIDDEN)),
            resident((HIDDEN, HIDDEN)), resident((1, HIDDEN)),
            resident((HIDDEN, out_p)), resident((1, out_p)),
        ],
        out_specs=out_spec,
        compiler_params=pltpu.CompilerParams(
            # Batch tiles are independent: shard across v7x's 2 TensorCores.
            dimension_semantics=("parallel",),
        ),
    )(x_p, w1_p, b1_f, w2, b2_f, w3_p, b3_p)

    # Glue: drop padding + the .view(-1, act_dim, n_atoms) of the PyTorch module.
    return logits_p[:B, :out_dim].reshape(B, act_dim, n_atoms)


def init_params(key, obs_dim, act_dim, n_atoms, hidden=HIDDEN, weight_dtype=jnp.float32):
    """PyTorch-Linear-style init (U[-1/sqrt(fan_in), 1/sqrt(fan_in)])."""
    dims = [(obs_dim, hidden), (hidden, hidden), (hidden, act_dim * n_atoms)]
    params = []
    keys = jax.random.split(key, 2 * len(dims))
    for i, (fan_in, fan_out) in enumerate(dims):
        bound = 1.0 / jnp.sqrt(fan_in)
        w = jax.random.uniform(keys[2 * i], (fan_in, fan_out), jnp.float32, -bound, bound)
        b = jax.random.uniform(keys[2 * i + 1], (1, fan_out), jnp.float32, -bound, bound)
        params += [w.astype(weight_dtype), b]
    return tuple(params)


def _reference(x, params, act_dim, n_atoms):
    w1, b1, w2, b2, w3, b3 = [p.astype(jnp.float32) for p in params]
    h1 = jnp.maximum(x @ w1 + b1, 0.0)
    h2 = jnp.maximum(h1 @ w2 + b2, 0.0)
    return (h2 @ w3 + b3).reshape(x.shape[0], act_dim, n_atoms)


if __name__ == "__main__":
    # Small shapes consistent with the module's forward: x is (batch, obs_dim).
    batch, obs_dim, act_dim, n_atoms = 2, 8, 4, 16
    v_min, v_max = -10.0, 10.0

    key = jax.random.PRNGKey(0)
    k_x, k_p, k_big = jax.random.split(key, 3)
    x = jax.random.normal(k_x, (batch, obs_dim), dtype=jnp.float32)
    params = init_params(k_p, obs_dim, act_dim, n_atoms)

    # The registered buffer `atoms` is not used in forward(); kept for parity.
    atoms = jnp.linspace(v_min, v_max, n_atoms)

    # --- f32 run (exactness check) -------------------------------------------
    logits = qnetwork_forward(x, params, act_dim=act_dim, n_atoms=n_atoms)
    logits = jax.block_until_ready(logits)
    ref = _reference(x, params, act_dim, n_atoms)
    assert logits.shape == (batch, act_dim, n_atoms)
    assert jnp.allclose(logits, ref, atol=1e-4, rtol=1e-5)

    # --- multi-tile batch grid (exercise the (i,0) batch tiling + padding) ----
    big_b = 200
    x_big = jax.random.normal(k_big, (big_b, obs_dim), dtype=jnp.float32)
    logits_big = qnetwork_forward(x_big, params, act_dim=act_dim, n_atoms=n_atoms,
                                  block_b=64)
    logits_big = jax.block_until_ready(logits_big)
    ref_big = _reference(x_big, params, act_dim, n_atoms)
    assert logits_big.shape == (big_b, act_dim, n_atoms)
    assert jnp.allclose(logits_big, ref_big, atol=1e-4, rtol=1e-5)

    # --- bf16 weights (MXU bf16 operands, f32 accumulate; loose tolerance) ----
    params_bf16 = tuple(p.astype(jnp.bfloat16) if p.ndim == 2 and p.shape[0] > 1 else p
                        for p in params)
    logits_bf16 = qnetwork_forward(x_big, params_bf16, act_dim=act_dim,
                                   n_atoms=n_atoms, block_b=64)
    logits_bf16 = jax.block_until_ready(logits_bf16)
    assert logits_bf16.shape == (big_b, act_dim, n_atoms)
    assert jnp.allclose(logits_bf16, ref_big, atol=5e-2, rtol=5e-2)

    print("KERNEL_OK")
</pallas_src>

<mosaic_0001>
module attributes {stable_mosaic.version = 11 : i64} {
  func.func @qnet_kernel(%arg0: i32, %arg1: memref<8x128xf32, #tpu.memory_space<vmem>>, %arg2: memref<128x128xf32, #tpu.memory_space<vmem>>, %arg3: memref<1x128xf32, #tpu.memory_space<vmem>>, %arg4: memref<128x128xf32, #tpu.memory_space<vmem>>, %arg5: memref<1x128xf32, #tpu.memory_space<vmem>>, %arg6: memref<128x128xf32, #tpu.memory_space<vmem>>, %arg7: memref<1x128xf32, #tpu.memory_space<vmem>>, %arg8: memref<8x128xf32, #tpu.memory_space<vmem>>) attributes {dimension_semantics = [#tpu.dimension_semantics<parallel>], iteration_bounds = array<i64: 1>, scalar_prefetch = 0 : i64, scratch_operands = 0 : i64, tpu.core_type = #tpu.core_type<tc>, window_params = [{transform_indices = @transform_0, window_bounds = array<i64: 8, 128>}, {pipeline_mode = #tpu.pipeline_mode<synchronous>, transform_indices = @transform_1, window_bounds = array<i64: 128, 128>}, {pipeline_mode = #tpu.pipeline_mode<synchronous>, transform_indices = @transform_2, window_bounds = array<i64: 1, 128>}, {pipeline_mode = #tpu.pipeline_mode<synchronous>, transform_indices = @transform_3, window_bounds = array<i64: 128, 128>}, {pipeline_mode = #tpu.pipeline_mode<synchronous>, transform_indices = @transform_4, window_bounds = array<i64: 1, 128>}, {pipeline_mode = #tpu.pipeline_mode<synchronous>, transform_indices = @transform_5, window_bounds = array<i64: 128, 128>}, {pipeline_mode = #tpu.pipeline_mode<synchronous>, transform_indices = @transform_6, window_bounds = array<i64: 1, 128>}, {transform_indices = @transform_7, window_bounds = array<i64: 8, 128>}]} {
    %c0 = arith.constant 0 : index
    %c0_0 = arith.constant 0 : index
    %0 = vector.load %arg1[%c0, %c0_0] : memref<8x128xf32, #tpu.memory_space<vmem>>, vector<8x128xf32>
    %c0_1 = arith.constant 0 : index
    %c0_2 = arith.constant 0 : index
    %1 = vector.load %arg2[%c0_1, %c0_2] : memref<128x128xf32, #tpu.memory_space<vmem>>, vector<128x128xf32>
    %cst = arith.constant dense<0.000000e+00> : vector<8x128xf32>
    %2 = tpu.matmul %0, %1, %cst {dimension_numbers = #tpu.dot_dimension_numbers<[1], [0], [0], [1], [0, 0, 1, 1], [], []>} : vector<8x128xf32>, vector<128x128xf32>, vector<8x128xf32> -> vector<8x128xf32>
    %c0_3 = arith.constant 0 : index
    %c0_4 = arith.constant 0 : index
    %3 = vector.load %arg3[%c0_3, %c0_4] : memref<1x128xf32, #tpu.memory_space<vmem>>, vector<1x128xf32>
    %4 = vector.broadcast %3 : vector<1x128xf32> to vector<8x128xf32>
    %5 = arith.addf %2, %4 : vector<8x128xf32>
    %cst_5 = arith.constant 0.000000e+00 : f32
    %6 = vector.broadcast %cst_5 : f32 to vector<8x128xf32>
    %7 = arith.maximumf %5, %6 : vector<8x128xf32>
    %c0_6 = arith.constant 0 : index
    %c0_7 = arith.constant 0 : index
    %8 = vector.load %arg4[%c0_6, %c0_7] : memref<128x128xf32, #tpu.memory_space<vmem>>, vector<128x128xf32>
    %cst_8 = arith.constant dense<0.000000e+00> : vector<8x128xf32>
    %9 = tpu.matmul %7, %8, %cst_8 {dimension_numbers = #tpu.dot_dimension_numbers<[1], [0], [0], [1], [0, 0, 1, 1], [], []>} : vector<8x128xf32>, vector<128x128xf32>, vector<8x128xf32> -> vector<8x128xf32>
    %c0_9 = arith.constant 0 : index
    %c0_10 = arith.constant 0 : index
    %10 = vector.load %arg5[%c0_9, %c0_10] : memref<1x128xf32, #tpu.memory_space<vmem>>, vector<1x128xf32>
    %11 = vector.broadcast %10 : vector<1x128xf32> to vector<8x128xf32>
    %12 = arith.addf %9, %11 : vector<8x128xf32>
    %cst_11 = arith.constant 0.000000e+00 : f32
    %13 = vector.broadcast %cst_11 : f32 to vector<8x128xf32>
    %14 = arith.maximumf %12, %13 : vector<8x128xf32>
    %c0_12 = arith.constant 0 : index
    %c0_13 = arith.constant 0 : index
    %15 = vector.load %arg6[%c0_12, %c0_13] : memref<128x128xf32, #tpu.memory_space<vmem>>, vector<128x128xf32>
    %cst_14 = arith.constant dense<0.000000e+00> : vector<8x128xf32>
    %16 = tpu.matmul %14, %15, %cst_14 {dimension_numbers = #tpu.dot_dimension_numbers<[1], [0], [0], [1], [0, 0, 1, 1], [], []>} : vector<8x128xf32>, vector<128x128xf32>, vector<8x128xf32> -> vector<8x128xf32>
    %c0_15 = arith.constant 0 : index
    %c0_16 = arith.constant 0 : index
    %17 = vector.load %arg7[%c0_15, %c0_16] : memref<1x128xf32, #tpu.memory_space<vmem>>, vector<1x128xf32>
    %18 = vector.broadcast %17 : vector<1x128xf32> to vector<8x128xf32>
    %19 = arith.addf %16, %18 : vector<8x128xf32>
    %c0_17 = arith.constant 0 : index
    %c0_18 = arith.constant 0 : index
    %20 = vector.load %arg8[%c0_17, %c0_18] : memref<8x128xf32, #tpu.memory_space<vmem>>, vector<8x128xf32>
    tpu.vector_store %arg8[%c0_17, %c0_18], %19 {strides = array<i32>} : memref<8x128xf32, #tpu.memory_space<vmem>>, vector<8x128xf32>,
    return
  }
  func.func @transform_0(%arg0: i32) -> (i32, i32) {
    %c0_i32 = arith.constant 0 : i32
    %c0_i32_0 = arith.constant 0 : i32
    return %arg0, %c0_i32 : i32, i32
  }
  func.func @transform_1(%arg0: i32) -> (i32, i32) {
    %c0_i32 = arith.constant 0 : i32
    %c0_i32_0 = arith.constant 0 : i32
    %c0_i32_1 = arith.constant 0 : i32
    return %c0_i32, %c0_i32_0 : i32, i32
  }
  func.func @transform_2(%arg0: i32) -> (i32, i32) {
    %c0_i32 = arith.constant 0 : i32
    %c0_i32_0 = arith.constant 0 : i32
    %c0_i32_1 = arith.constant 0 : i32
    return %c0_i32, %c0_i32_0 : i32, i32
  }
  func.func @transform_3(%arg0: i32) -> (i32, i32) {
    %c0_i32 = arith.constant 0 : i32
    %c0_i32_0 = arith.constant 0 : i32
    %c0_i32_1 = arith.constant 0 : i32
    return %c0_i32, %c0_i32_0 : i32, i32
  }
  func.func @transform_4(%arg0: i32) -> (i32, i32) {
    %c0_i32 = arith.constant 0 : i32
    %c0_i32_0 = arith.constant 0 : i32
    %c0_i32_1 = arith.constant 0 : i32
    return %c0_i32, %c0_i32_0 : i32, i32
  }
  func.func @transform_5(%arg0: i32) -> (i32, i32) {
    %c0_i32 = arith.constant 0 : i32
    %c0_i32_0 = arith.constant 0 : i32
    %c0_i32_1 = arith.constant 0 : i32
    return %c0_i32, %c0_i32_0 : i32, i32
  }
  func.func @transform_6(%arg0: i32) -> (i32, i32) {
    %c0_i32 = arith.constant 0 : i32
    %c0_i32_0 = arith.constant 0 : i32
    %c0_i32_1 = arith.constant 0 : i32
    return %c0_i32, %c0_i32_0 : i32, i32
  }
  func.func @transform_7(%arg0: i32) -> (i32, i32) {
    %c0_i32 = arith.constant 0 : i32
    %c0_i32_0 = arith.constant 0 : i32
    return %arg0, %c0_i32 : i32, i32
  }
}

</mosaic_0001>

<bundles_post_ra>
// kernel: qnetwork_forward.1
= control target key start
LH: loop header
LB: loop body
LE: loop exit
PB: predicated region body
PF: predicated region fallthrough
CT: control target
= control target key end

     0   :  { %v547_v0 = vmov 0.0|0.0   ;;  %vm548_vm0 = vmmov 0   ;;  %v549_v4 = vmov 0.0   ;;  %s779_s1 = inlined_call_operand.vmem [shape: f32[128,128], index: 1, kind: input, shape index: {}]   ;;  %s780_s3 = inlined_call_operand.vmem [shape: f32[128,128], index: 3, kind: input, shape index: {}]   ;;  %s781_s0 = inlined_call_operand.vmem [shape: f32[8,128], index: 0, kind: input, shape index: {}]   ;;  %s782_s5 = inlined_call_operand.vmem [shape: f32[128,128], index: 5, kind: input, shape index: {}]   ;;  %s783_s2 = inlined_call_operand.vmem [shape: f32[1,128], index: 2, kind: input, shape index: {}]   ;;  %s784_s4 = inlined_call_operand.vmem [shape: f32[1,128], index: 4, kind: input, shape index: {}]   ;;  %s785_s6 = inlined_call_operand.vmem [shape: f32[1,128], index: 6, kind: input, shape index: {}]   ;;  %s786_s7 = inlined_call_operand.vmem [shape: f32[8,128], index: 7, kind: output, shape index: {}]  }
   0x1   :  { %472 = vmatprep.subr.bf16.mxu0 %v547_v0  ;;  %v27_v1 = vld [vmem:[%s779_s1] sm:$0xff]  ;;  %v28_v2 = vld [vmem:[%s779_s1 + $0x8] sm:$0xff]  ;;  %v29_v3 = vld [vmem:[%s779_s1 + $0x10] sm:$0xff]  ;;  %399 = vmatprep.mubr.msk.f32.mxu0 %vm548_vm0, %v549_v4 }
   0x2   :  { %v473_v5 = vpack.c.bf16 %v28_v2, %v27_v1  ;;  %v30_v6 = vld [vmem:[%s779_s1 + $0x18] sm:$0xff]  ;;  %496 = vmatprep.subr.bf16.mxu1 %v547_v0  ;;  %434 = vmatprep.mubr.msk.f32.mxu1 %vm548_vm0, %v549_v4  ;;  %v31_v8 = vld [vmem:[%s779_s1 + $0x20] sm:$0xff]  ;;  %v32_v9 = vld [vmem:[%s779_s1 + $0x28] sm:$0xff] }
   0x3   :  { %v476_v7 = vpack.c.bf16 %v30_v6, %v29_v3  ;;  %v121_v10 = vld [vmem:[%s780_s3] sm:$0xff]  ;;  %v122_v11 = vld [vmem:[%s780_s3 + $0x8] sm:$0xff]  ;;  %v123_v12 = vld [vmem:[%s780_s3 + $0x10] sm:$0xff]  ;;  %v479_v14 = vpack.c.bf16 %v32_v9, %v31_v8 }
   0x4   :  { %474 = vmatpush3.bf16.msra.mxu0 %v473_v5  ;;  %v124_v13 = vld [vmem:[%s780_s3 + $0x18] sm:$0xff]  ;;  %v497_v15 = vpack.c.bf16 %v122_v11, %v121_v10  ;;  %v33_v16 = vld [vmem:[%s779_s1 + $0x30] sm:$0xff]  ;;  %v125_v19 = vld [vmem:[%s780_s3 + $0x20] sm:$0xff] }
   0x5   :  { %475 = vmatprep.subr.bf16.mxu0 %v547_v0  ;;  %v34_v17 = vld [vmem:[%s779_s1 + $0x38] sm:$0xff]  ;;  %v500_v18 = vpack.c.bf16 %v124_v13, %v123_v12  ;;  %v126_v20 = vld [vmem:[%s780_s3 + $0x28] sm:$0xff]  ;;  %v35_v22 = vld [vmem:[%s779_s1 + $0x40] sm:$0xff] }
   0x6   :  { %498 = vmatpush3.bf16.msra.mxu1 %v497_v15  ;;  %v482_v21 = vpack.c.bf16 %v34_v17, %v33_v16  ;;  %v36_v23 = vld [vmem:[%s779_s1 + $0x48] sm:$0xff]  ;;  %v503_v24 = vpack.c.bf16 %v126_v20, %v125_v19  ;;  %v127_v25 = vld [vmem:[%s780_s3 + $0x30] sm:$0xff]  ;;  %v128_v26 = vld [vmem:[%s780_s3 + $0x38] sm:$0xff] }
   0x7   :  { %499 = vmatprep.subr.bf16.mxu1 %v547_v0  ;;  %v485_v27 = vpack.c.bf16 %v36_v23, %v35_v22  ;;  %v37_v28 = vld [vmem:[%s779_s1 + $0x50] sm:$0xff]  ;;  %v38_v29 = vld [vmem:[%s779_s1 + $0x58] sm:$0xff]  ;;  %v506_v30 = vpack.c.bf16 %v128_v26, %v127_v25  ;;  %v129_v31 = vld [vmem:[%s780_s3 + $0x40] sm:$0xff] }
   0x8   :  { %477 = vmatpush3.bf16.msra.mxu0 %v476_v7  ;;  %v130_v32 = vld [vmem:[%s780_s3 + $0x48] sm:$0xff]  ;;  %v488_v33 = vpack.c.bf16 %v38_v29, %v37_v28  ;;  %v39_v34 = vld [vmem:[%s779_s1 + $0x60] sm:$0xff]  ;;  %v131_v37 = vld [vmem:[%s780_s3 + $0x50] sm:$0xff] }
   0x9   :  { %478 = vmatprep.subr.bf16.mxu0 %v547_v0  ;;  %v40_v35 = vld [vmem:[%s779_s1 + $0x68] sm:$0xff]  ;;  %v509_v36 = vpack.c.bf16 %v130_v32, %v129_v31  ;;  %v132_v38 = vld [vmem:[%s780_s3 + $0x58] sm:$0xff]  ;;  %v41_v40 = vld [vmem:[%s779_s1 + $0x70] sm:$0xff] }
   0xa   :  { %501 = vmatpush3.bf16.msra.mxu1 %v500_v18  ;;  %v491_v39 = vpack.c.bf16 %v40_v35, %v39_v34  ;;  %v42_v41 = vld [vmem:[%s779_s1 + $0x78] sm:$0xff]  ;;  %v512_v42 = vpack.c.bf16 %v132_v38, %v131_v37  ;;  %v133_v43 = vld [vmem:[%s780_s3 + $0x60] sm:$0xff]  ;;  %v134_v44 = vld [vmem:[%s780_s3 + $0x68] sm:$0xff] }
   0xb   :  { %502 = vmatprep.subr.bf16.mxu1 %v547_v0  ;;  %v494_v45 = vpack.c.bf16 %v42_v41, %v41_v40  ;;  %v515_v46 = vpack.c.bf16 %v134_v44, %v133_v43  ;;  %v26_v47 = vld [vmem:[%s781_s0] sm:$0xff]  ;;  %v135_v48 = vld [vmem:[%s780_s3 + $0x70] sm:$0xff]  ;;  %v136_v49 = vld [vmem:[%s780_s3 + $0x78] sm:$0xff] }
   0xc   :  { %480 = vmatpush3.bf16.msra.mxu0 %v479_v14  ;;  %v518_v50 = vpack.c.bf16 %v136_v49, %v135_v48  ;;  %v215_v51 = vld [vmem:[%s782_s5] sm:$0xff]  ;;  %v216_v52 = vld [vmem:[%s782_s5 + $0x8] sm:$0xff]  ;;  %v217_v53 = vld [vmem:[%s782_s5 + $0x10] sm:$0xff] }
   0xd   :  { %481 = vmatprep.subr.bf16.mxu0 %v547_v0  ;;  %v521_v54 = vpack.c.bf16 %v216_v52, %v215_v51  ;;  %v218_v55 = vld [vmem:[%s782_s5 + $0x18] sm:$0xff]  ;;  %v219_v57 = vld [vmem:[%s782_s5 + $0x20] sm:$0xff]  ;;  %v220_v58 = vld [vmem:[%s782_s5 + $0x28] sm:$0xff] }
   0xe   :  { %504 = vmatpush3.bf16.msra.mxu1 %v503_v24  ;;  %v524_v56 = vpack.c.bf16 %v218_v55, %v217_v53  ;;  %v527_v59 = vpack.c.bf16 %v220_v58, %v219_v57  ;;  %v221_v60 = vld [vmem:[%s782_s5 + $0x30] sm:$0xff]  ;;  %v222_v61 = vld [vmem:[%s782_s5 + $0x38] sm:$0xff]  ;;  %v223_v63 = vld [vmem:[%s782_s5 + $0x40] sm:$0xff] }
   0xf   :  { %505 = vmatprep.subr.bf16.mxu1 %v547_v0  ;;  %v530_v62 = vpack.c.bf16 %v222_v61, %v221_v60  ;;  %v224_v1 = vld [vmem:[%s782_s5 + $0x48] sm:$0xff]  ;;  %v225_v3 = vld [vmem:[%s782_s5 + $0x50] sm:$0xff]  ;;  %v227_v6 = vld [vmem:[%s782_s5 + $0x60] sm:$0xff] }
  0x10   :  { %483 = vmatpush3.bf16.msra.mxu0 %v482_v21  ;;  %v533_v2 = vpack.c.bf16 %v224_v1, %v223_v63  ;;  %v228_v7 = vld [vmem:[%s782_s5 + $0x68] sm:$0xff]  ;;  %v313_v9 = vld [vmem:[%s783_s2] ss:$0 sm:$0xff]  ;;  %v229_v14 = vld [vmem:[%s782_s5 + $0x70] sm:$0xff] }
  0x11   :  { %484 = vmatprep.subr.bf16.mxu0 %v547_v0  ;;  %v539_v8 = vpack.c.bf16 %v228_v7, %v227_v6  ;;  %v230_v15 = vld [vmem:[%s782_s5 + $0x78] sm:$0xff]  ;;  %v315_v21 = vld [vmem:[%s785_s6] ss:$0 sm:$0xff] }
  0x12   :  { %507 = vmatpush3.bf16.msra.mxu1 %v506_v30  ;;  %v542_v16 = vpack.c.bf16 %v230_v15, %v229_v14 }
  0x13   :  { %508 = vmatprep.subr.bf16.mxu1 %v547_v0 }
  0x14   :  { %486 = vmatpush3.bf16.msra.mxu0 %v485_v27 }
  0x15   :  { %487 = vmatprep.subr.bf16.mxu0 %v547_v0 }
  0x16   :  { %510 = vmatpush3.bf16.msra.mxu1 %v509_v36 }
  0x17   :  { %511 = vmatprep.subr.bf16.mxu1 %v547_v0 }
  0x18   :  { %489 = vmatpush3.bf16.msra.mxu0 %v488_v33 }
  0x19   :  { %490 = vmatprep.subr.bf16.mxu0 %v547_v0 }
  0x1a   :  { %513 = vmatpush3.bf16.msra.mxu1 %v512_v42 }
  0x1b   :  { %514 = vmatprep.subr.bf16.mxu1 %v547_v0 }
  0x1c   :  { %492 = vmatpush3.bf16.msra.mxu0 %v491_v39 }
  0x1d   :  { %493 = vmatprep.subr.bf16.mxu0 %v547_v0 }
  0x1e   :  { %516 = vmatpush3.bf16.msra.mxu1 %v515_v46 }
  0x1f   :  { %517 = vmatprep.subr.bf16.mxu1 %v547_v0 }
  0x20   :  { %495 = vmatpush3.bf16.msra.mxu0 %v494_v45 }
  0x21   :  { %520 = vmatprep.subr.bf16.mxu0 %v547_v0 }
  0x22   :  { %519 = vmatpush3.bf16.msra.mxu1 %v518_v50 }
  0x23   :  { %400 = vmatmul.mubr.f32.vlgmr.msra.gmra.mrb[0].mxu0 %v26_v47 }
  0x24   :  { %469 = vmatprep.mubr.msk.f32.mxu0 %vm548_vm0, %v549_v4  ;;  %522 = vmatpush3.bf16.msra.mxu0 %v521_v54  ;;  %v226_v4 = vld [vmem:[%s782_s5 + $0x58] sm:$0xff] }
  0x25   :  { %523 = vmatprep.subr.bf16.mxu0 %v547_v0  ;;  %v536_v5 = vpack.c.bf16 %v226_v4, %v225_v3 }
  0x28   :  { %525 = vmatpush3.bf16.msra.mxu0 %v524_v56 }
  0x29   :  { %526 = vmatprep.subr.bf16.mxu0 %v547_v0 }
  0x2c   :  { %528 = vmatpush3.bf16.msra.mxu0 %v527_v59 }
  0x2d   :  { %529 = vmatprep.subr.bf16.mxu0 %v547_v0 }
  0x30   :  { %531 = vmatpush3.bf16.msra.mxu0 %v530_v62 }
  0x31   :  { %532 = vmatprep.subr.bf16.mxu0 %v547_v0 }
  0x34   :  { %534 = vmatpush3.bf16.msra.mxu0 %v533_v2 }
  0x35   :  { %535 = vmatprep.subr.bf16.mxu0 %v547_v0 }
  0x38   :  { %537 = vmatpush3.bf16.msra.mxu0 %v536_v5 }
  0x39   :  { %538 = vmatprep.subr.bf16.mxu0 %v547_v0 }
  0x3c   :  { %540 = vmatpush3.bf16.msra.mxu0 %v539_v8 }
  0x3d   :  { %541 = vmatprep.subr.bf16.mxu0 %v547_v0  ;;  %v314_v0 = vld [vmem:[%s784_s4] ss:$0 sm:$0xff] }
  0x40   :  { %543 = vmatpush3.bf16.msra.mxu0 %v542_v16 }
  0xf6   :  { %v116_v10 = vpop.f32.mrb[0].mxu0 }
  0xf7   :  { %v117_v11 = vadd.f32 %v313_v9, %v116_v10  ;;  %v401_v12 = vpop.f32.mrb[1].mxu0 }
  0xf9   :  { %v120_v13 = vmax.f32 %v117_v11, 0.0 }
  0xfb   :  { %435 = vmatmul.mubr.f32.vlgmr.msra.gmra.mrb[0].mxu1 %v120_v13 }
 0x1ce   :  { %v210_v17 = vpop.f32.mrb[0].mxu1 }
 0x1cf   :  { %v211_v18 = vadd.f32 %v314_v0, %v210_v17  ;;  %v436_v19 = vpop.f32.mrb[1].mxu1 }
 0x1d1   :  { %v214_v20 = vmax.f32 %v211_v18, 0.0 }
 0x1d3   :  { %470 = vmatmul.mubr.f32.vlgmr.msra.gmra.mrb[2].mxu0 %v214_v20 }
 0x2a6   :  { %v304_v22 = vpop.f32.mrb[2].mxu0 }
 0x2a7   :  { %v305_v23 = vadd.f32 %v315_v21, %v304_v22  ;;  %v471_v24 = vpop.f32.mrb[3].mxu0 }
 0x2a9   :  { %308 = vst [vmem:[%s786_s7] sm:$0xff] %v305_v23 }

</bundles_post_ra>
